<compile_context>
chip_gen: v6e
topology: v6e:2x2x1
jax: 0.10.0
libtpu: 0.0.40
codegen_flags: <defaults>
</compile_context>

<pallas_src>
import functools

import jax
import jax.numpy as jnp
from jax.experimental import pallas as pl
from jax.experimental.pallas import tpu as pltpu


def _postnet_kernel(K, NB, x_ref, w_ref, b_ref, o_ref, col_ref):
    # x_ref  : (NB, C_in, Lp)    padded inputs for this batch tile (lane axis = L)
    # w_ref  : (C_out, K*C_in)   BN-folded conv weights, tap-major columns
    # b_ref  : (C_out, 1)        BN-folded bias
    # o_ref  : (NB, C_out, L)    output, NCL layout (lane-dense along L)
    # col_ref: (K*C_in, L)       VMEM scratch: im2col column matrix (reused per n)
    C_in = x_ref.shape[1]
    L = o_ref.shape[2]

    w = w_ref[...]          # hoisted: loaded once per grid step
    bias = b_ref[...]       # (C_out, 1), broadcasts over the lane axis

    for n in range(NB):     # static unroll over the batch tile
        xn = x_ref[n]       # (C_in, Lp): single load, then value slices per tap
        # im2col: row block k holds x_pad[n, :, l + k] for l in [0, L).
        for k in range(K):  # static unroll over taps; sublane offsets are *C_in
            col_ref[k * C_in:(k + 1) * C_in, :] = xn[:, k:k + L]
        # One MXU contraction of depth K*C_in, f32 accumulation.
        acc = jnp.dot(w, col_ref[...],
                      preferred_element_type=jnp.float32)        # (C_out, L)
        # Bias + Tanh; Dropout is identity in eval mode.
        o_ref[n] = jnp.tanh(acc + bias).astype(o_ref.dtype)


def postnet_conv(x, w, b, gamma, beta, run_mean, run_var, *,
                 eps=1e-5, batch_tile=None):
    """x: (N, C_in, L) f32; w: (C_out, C_in, K) (torch layout). Returns (N, C_out, L)."""
    N, C_in, L = x.shape
    C_out, _, K = w.shape
    pad = K // 2

    if batch_tile is None:
        batch_tile = N          # whole batch in one grid step at small N
    assert N % batch_tile == 0, "batch_tile must divide the batch size"
    NB = batch_tile

    # --- wrapper glue (plain JAX) ---------------------------------------
    # Fold BatchNorm (inference, running stats) into the conv weights / bias.
    scale = gamma * jax.lax.rsqrt(run_var + eps)                       # (C_out,)
    w_folded = (jnp.transpose(w, (0, 2, 1)).reshape(C_out, K * C_in)
                * scale[:, None])                                      # (C_out, K*C_in)
    b_folded = ((b - run_mean) * scale + beta).reshape(C_out, 1)       # (C_out, 1)

    # Zero-pad the length (lane) axis by K//2 on both sides; stay in NCL layout.
    xp = jnp.pad(x, ((0, 0), (0, 0), (pad, pad)))                      # (N, C_in, Lp)
    Lp = L + 2 * pad

    out = pl.pallas_call(
        functools.partial(_postnet_kernel, K, NB),
        out_shape=jax.ShapeDtypeStruct((N, C_out, L), x.dtype),
        grid=(N // NB,),
        in_specs=[
            pl.BlockSpec((NB, C_in, Lp), lambda i: (i, 0, 0)),
            pl.BlockSpec((C_out, K * C_in), lambda i: (0, 0)),
            pl.BlockSpec((C_out, 1), lambda i: (0, 0)),
        ],
        out_specs=pl.BlockSpec((NB, C_out, L), lambda i: (i, 0, 0)),
        scratch_shapes=[pltpu.VMEM((K * C_in, L), jnp.float32)],
        compiler_params=pltpu.CompilerParams(
            dimension_semantics=("parallel",)),
    )(xp, w_folded, b_folded)

    return out                                                         # (N, C_out, L)


def _reference(x, w, b, gamma, beta, mu, var, eps=1e-5):
    """Pure-JAX reference (conv + inference BN + tanh)."""
    K = w.shape[-1]
    y = jax.lax.conv_general_dilated(
        x, w, window_strides=(1,), padding=[(K // 2, K // 2)],
        dimension_numbers=("NCH", "OIH", "NCH"))
    y = y + b[None, :, None]
    scale = (gamma / jnp.sqrt(var + eps))[None, :, None]
    y = (y - mu[None, :, None]) * scale + beta[None, :, None]
    return jnp.tanh(y)


if __name__ == "__main__":
    # Small shapes consistent with the module: PostNetConv(input_dim=8,
    # output_dim=16, kernel_size=5) applied to x of shape (N=2, C_in=8, L=24).
    N, C_in, C_out, L, K = 2, 8, 16, 24, 5

    key = jax.random.PRNGKey(0)
    kx, kw, kb, kg, kbe, kmu, kvar = jax.random.split(key, 7)

    x = jax.random.normal(kx, (N, C_in, L), dtype=jnp.float32)
    w = 0.1 * jax.random.normal(kw, (C_out, C_in, K), dtype=jnp.float32)
    b = 0.1 * jax.random.normal(kb, (C_out,), dtype=jnp.float32)
    gamma = 1.0 + 0.1 * jax.random.normal(kg, (C_out,), dtype=jnp.float32)
    beta = 0.1 * jax.random.normal(kbe, (C_out,), dtype=jnp.float32)
    run_mean = 0.1 * jax.random.normal(kmu, (C_out,), dtype=jnp.float32)
    run_var = 0.5 + jnp.abs(jax.random.normal(kvar, (C_out,), dtype=jnp.float32))

    out = postnet_conv(x, w, b, gamma, beta, run_mean, run_var)
    out = jax.block_until_ready(out)

    ref = _reference(x, w, b, gamma, beta, run_mean, run_var)
    assert out.shape == (N, C_out, L), out.shape
    assert jnp.allclose(out, ref, atol=1e-5, rtol=1e-5), (
        float(jnp.max(jnp.abs(out - ref))))

    print("KERNEL_OK")
</pallas_src>

<mosaic_0001>
module attributes {stable_mosaic.version = 11 : i64} {
  func.func @_postnet_kernel(%arg0: i32, %arg1: memref<2x8x28xf32, #tpu.memory_space<vmem>>, %arg2: memref<16x40xf32, #tpu.memory_space<vmem>>, %arg3: memref<16x1xf32, #tpu.memory_space<vmem>>, %arg4: memref<2x16x24xf32, #tpu.memory_space<vmem>>, %arg5: memref<40x24xf32, #tpu.memory_space<vmem>>) attributes {dimension_semantics = [#tpu.dimension_semantics<parallel>], iteration_bounds = array<i64: 1>, scalar_prefetch = 0 : i64, scratch_operands = 1 : i64, tpu.core_type = #tpu.core_type<tc>, window_params = [{transform_indices = @transform_0, window_bounds = array<i64: 2, 8, 28>}, {pipeline_mode = #tpu.pipeline_mode<synchronous>, transform_indices = @transform_1, window_bounds = array<i64: 16, 40>}, {pipeline_mode = #tpu.pipeline_mode<synchronous>, transform_indices = @transform_2, window_bounds = array<i64: 16, 1>}, {transform_indices = @transform_3, window_bounds = array<i64: 2, 16, 24>}]} {
    %c0 = arith.constant 0 : index
    %c0_0 = arith.constant 0 : index
    %0 = vector.load %arg2[%c0, %c0_0] : memref<16x40xf32, #tpu.memory_space<vmem>>, vector<16x40xf32>
    %c0_1 = arith.constant 0 : index
    %c0_2 = arith.constant 0 : index
    %1 = vector.load %arg3[%c0_1, %c0_2] : memref<16x1xf32, #tpu.memory_space<vmem>>, vector<16x1xf32>
    %c0_3 = arith.constant 0 : index
    %c0_4 = arith.constant 0 : index
    %c0_5 = arith.constant 0 : index
    %2 = vector.load %arg1[%c0_3, %c0_4, %c0_5] : memref<2x8x28xf32, #tpu.memory_space<vmem>>, vector<1x8x28xf32>
    %3 = vector.shape_cast %2 : vector<1x8x28xf32> to vector<8x28xf32>
    %4 = vector.extract_strided_slice %3 {offsets = [0, 0], sizes = [8, 24], strides = [1, 1]} : vector<8x28xf32> to vector<8x24xf32>
    %c0_6 = arith.constant 0 : index
    %c0_7 = arith.constant 0 : index
    %5 = vector.load %arg5[%c0_6, %c0_7] : memref<40x24xf32, #tpu.memory_space<vmem>>, vector<8x24xf32>
    tpu.vector_store %arg5[%c0_6, %c0_7], %4 {strides = array<i32>} : memref<40x24xf32, #tpu.memory_space<vmem>>, vector<8x24xf32>,
    %6 = vector.extract_strided_slice %3 {offsets = [0, 1], sizes = [8, 24], strides = [1, 1]} : vector<8x28xf32> to vector<8x24xf32>
    %c8 = arith.constant 8 : index
    %c0_8 = arith.constant 0 : index
    %7 = vector.load %arg5[%c8, %c0_8] : memref<40x24xf32, #tpu.memory_space<vmem>>, vector<8x24xf32>
    tpu.vector_store %arg5[%c8, %c0_8], %6 {strides = array<i32>} : memref<40x24xf32, #tpu.memory_space<vmem>>, vector<8x24xf32>,
    %8 = vector.extract_strided_slice %3 {offsets = [0, 2], sizes = [8, 24], strides = [1, 1]} : vector<8x28xf32> to vector<8x24xf32>
    %c16 = arith.constant 16 : index
    %c0_9 = arith.constant 0 : index
    %9 = vector.load %arg5[%c16, %c0_9] : memref<40x24xf32, #tpu.memory_space<vmem>>, vector<8x24xf32>
    tpu.vector_store %arg5[%c16, %c0_9], %8 {strides = array<i32>} : memref<40x24xf32, #tpu.memory_space<vmem>>, vector<8x24xf32>,
    %10 = vector.extract_strided_slice %3 {offsets = [0, 3], sizes = [8, 24], strides = [1, 1]} : vector<8x28xf32> to vector<8x24xf32>
    %c24 = arith.constant 24 : index
    %c0_10 = arith.constant 0 : index
    %11 = vector.load %arg5[%c24, %c0_10] : memref<40x24xf32, #tpu.memory_space<vmem>>, vector<8x24xf32>
    tpu.vector_store %arg5[%c24, %c0_10], %10 {strides = array<i32>} : memref<40x24xf32, #tpu.memory_space<vmem>>, vector<8x24xf32>,
    %12 = vector.extract_strided_slice %3 {offsets = [0, 4], sizes = [8, 24], strides = [1, 1]} : vector<8x28xf32> to vector<8x24xf32>
    %c32 = arith.constant 32 : index
    %c0_11 = arith.constant 0 : index
    %13 = vector.load %arg5[%c32, %c0_11] : memref<40x24xf32, #tpu.memory_space<vmem>>, vector<8x24xf32>
    tpu.vector_store %arg5[%c32, %c0_11], %12 {strides = array<i32>} : memref<40x24xf32, #tpu.memory_space<vmem>>, vector<8x24xf32>,
    %c0_12 = arith.constant 0 : index
    %c0_13 = arith.constant 0 : index
    %14 = vector.load %arg5[%c0_12, %c0_13] : memref<40x24xf32, #tpu.memory_space<vmem>>, vector<40x24xf32>
    %cst = arith.constant dense<0.000000e+00> : vector<16x24xf32>
    %15 = tpu.matmul %0, %14, %cst {dimension_numbers = #tpu.dot_dimension_numbers<[1], [0], [0], [1], [0, 0, 1, 1], [], []>} : vector<16x40xf32>, vector<40x24xf32>, vector<16x24xf32> -> vector<16x24xf32>
    %16 = vector.broadcast %1 : vector<16x1xf32> to vector<16x24xf32>
    %17 = arith.addf %15, %16 : vector<16x24xf32>
    %18 = math.tanh %17 : vector<16x24xf32>
    %c0_14 = arith.constant 0 : index
    %c0_15 = arith.constant 0 : index
    %c0_16 = arith.constant 0 : index
    %19 = vector.load %arg4[%c0_14, %c0_15, %c0_16] : memref<2x16x24xf32, #tpu.memory_space<vmem>>, vector<1x16x24xf32>
    %20 = vector.shape_cast %19 : vector<1x16x24xf32> to vector<16x24xf32>
    %21 = vector.shape_cast %18 : vector<16x24xf32> to vector<1x16x24xf32>
    tpu.vector_store %arg4[%c0_14, %c0_15, %c0_16], %21 {strides = array<i32>} : memref<2x16x24xf32, #tpu.memory_space<vmem>>, vector<1x16x24xf32>,
    %c1 = arith.constant 1 : index
    %c0_17 = arith.constant 0 : index
    %c0_18 = arith.constant 0 : index
    %22 = vector.load %arg1[%c1, %c0_17, %c0_18] : memref<2x8x28xf32, #tpu.memory_space<vmem>>, vector<1x8x28xf32>
    %23 = vector.shape_cast %22 : vector<1x8x28xf32> to vector<8x28xf32>
    %24 = vector.extract_strided_slice %23 {offsets = [0, 0], sizes = [8, 24], strides = [1, 1]} : vector<8x28xf32> to vector<8x24xf32>
    %c0_19 = arith.constant 0 : index
    %c0_20 = arith.constant 0 : index
    %25 = vector.load %arg5[%c0_19, %c0_20] : memref<40x24xf32, #tpu.memory_space<vmem>>, vector<8x24xf32>
    tpu.vector_store %arg5[%c0_19, %c0_20], %24 {strides = array<i32>} : memref<40x24xf32, #tpu.memory_space<vmem>>, vector<8x24xf32>,
    %26 = vector.extract_strided_slice %23 {offsets = [0, 1], sizes = [8, 24], strides = [1, 1]} : vector<8x28xf32> to vector<8x24xf32>
    %c8_21 = arith.constant 8 : index
    %c0_22 = arith.constant 0 : index
    %27 = vector.load %arg5[%c8_21, %c0_22] : memref<40x24xf32, #tpu.memory_space<vmem>>, vector<8x24xf32>
    tpu.vector_store %arg5[%c8_21, %c0_22], %26 {strides = array<i32>} : memref<40x24xf32, #tpu.memory_space<vmem>>, vector<8x24xf32>,
    %28 = vector.extract_strided_slice %23 {offsets = [0, 2], sizes = [8, 24], strides = [1, 1]} : vector<8x28xf32> to vector<8x24xf32>
    %c16_23 = arith.constant 16 : index
    %c0_24 = arith.constant 0 : index
    %29 = vector.load %arg5[%c16_23, %c0_24] : memref<40x24xf32, #tpu.memory_space<vmem>>, vector<8x24xf32>
    tpu.vector_store %arg5[%c16_23, %c0_24], %28 {strides = array<i32>} : memref<40x24xf32, #tpu.memory_space<vmem>>, vector<8x24xf32>,
    %30 = vector.extract_strided_slice %23 {offsets = [0, 3], sizes = [8, 24], strides = [1, 1]} : vector<8x28xf32> to vector<8x24xf32>
    %c24_25 = arith.constant 24 : index
    %c0_26 = arith.constant 0 : index
    %31 = vector.load %arg5[%c24_25, %c0_26] : memref<40x24xf32, #tpu.memory_space<vmem>>, vector<8x24xf32>
    tpu.vector_store %arg5[%c24_25, %c0_26], %30 {strides = array<i32>} : memref<40x24xf32, #tpu.memory_space<vmem>>, vector<8x24xf32>,
    %32 = vector.extract_strided_slice %23 {offsets = [0, 4], sizes = [8, 24], strides = [1, 1]} : vector<8x28xf32> to vector<8x24xf32>
    %c32_27 = arith.constant 32 : index
    %c0_28 = arith.constant 0 : index
    %33 = vector.load %arg5[%c32_27, %c0_28] : memref<40x24xf32, #tpu.memory_space<vmem>>, vector<8x24xf32>
    tpu.vector_store %arg5[%c32_27, %c0_28], %32 {strides = array<i32>} : memref<40x24xf32, #tpu.memory_space<vmem>>, vector<8x24xf32>,
    %c0_29 = arith.constant 0 : index
    %c0_30 = arith.constant 0 : index
    %34 = vector.load %arg5[%c0_29, %c0_30] : memref<40x24xf32, #tpu.memory_space<vmem>>, vector<40x24xf32>
    %cst_31 = arith.constant dense<0.000000e+00> : vector<16x24xf32>
    %35 = tpu.matmul %0, %34, %cst_31 {dimension_numbers = #tpu.dot_dimension_numbers<[1], [0], [0], [1], [0, 0, 1, 1], [], []>} : vector<16x40xf32>, vector<40x24xf32>, vector<16x24xf32> -> vector<16x24xf32>
    %36 = vector.broadcast %1 : vector<16x1xf32> to vector<16x24xf32>
    %37 = arith.addf %35, %36 : vector<16x24xf32>
    %38 = math.tanh %37 : vector<16x24xf32>
    %c1_32 = arith.constant 1 : index
    %c0_33 = arith.constant 0 : index
    %c0_34 = arith.constant 0 : index
    %39 = vector.load %arg4[%c1_32, %c0_33, %c0_34] : memref<2x16x24xf32, #tpu.memory_space<vmem>>, vector<1x16x24xf32>
    %40 = vector.shape_cast %39 : vector<1x16x24xf32> to vector<16x24xf32>
    %41 = vector.shape_cast %38 : vector<16x24xf32> to vector<1x16x24xf32>
    tpu.vector_store %arg4[%c1_32, %c0_33, %c0_34], %41 {strides = array<i32>} : memref<2x16x24xf32, #tpu.memory_space<vmem>>, vector<1x16x24xf32>,
    return
  }
  func.func @transform_0(%arg0: i32) -> (i32, i32, i32) {
    %c0_i32 = arith.constant 0 : i32
    %c0_i32_0 = arith.constant 0 : i32
    %c0_i32_1 = arith.constant 0 : i32
    return %arg0, %c0_i32, %c0_i32_0 : i32, i32, i32
  }
  func.func @transform_1(%arg0: i32) -> (i32, i32) {
    %c0_i32 = arith.constant 0 : i32
    %c0_i32_0 = arith.constant 0 : i32
    %c0_i32_1 = arith.constant 0 : i32
    return %c0_i32, %c0_i32_0 : i32, i32
  }
  func.func @transform_2(%arg0: i32) -> (i32, i32) {
    %c0_i32 = arith.constant 0 : i32
    %c0_i32_0 = arith.constant 0 : i32
    %c0_i32_1 = arith.constant 0 : i32
    return %c0_i32, %c0_i32_0 : i32, i32
  }
  func.func @transform_3(%arg0: i32) -> (i32, i32, i32) {
    %c0_i32 = arith.constant 0 : i32
    %c0_i32_0 = arith.constant 0 : i32
    %c0_i32_1 = arith.constant 0 : i32
    return %arg0, %c0_i32, %c0_i32_0 : i32, i32, i32
  }
}

</mosaic_0001>

<bundles_post_ra>
// kernel: tpu_custom_call.1
= control target key start
LH: loop header
LB: loop body
LE: loop exit
PB: predicated region body
PF: predicated region fallthrough
CT: control target
= control target key end

     0   :  { %8 = vsyncpa [#allocation4], 0  ;;  %s455_s0 = inlined_call_operand.vmem [shape: f32[2,8,28], index: 0, kind: input, shape index: {}]   ;;  %s456_s1 = inlined_call_operand.hbm [shape: f32[16,40], index: 1, kind: input, shape index: {}]   ;;  %s457_s2 = inlined_call_operand.vmem [shape: f32[16,1], index: 2, kind: input, shape index: {}]   ;;  %s458_s3 = inlined_call_operand.hbm [shape: f32[2,16,24], index: 3, kind: output, shape index: {}]  }
   0x1   :  { %9 = vsyncpa [#allocation5], 0  ;;  %s384_s12 = smov [#allocation3]  }
   0x2   :  { %s17_s13 = sshll.u32 %s384_s12, 4  ;;  %s18_s13 = int_to_ptr.vmem [resolvable:$true] %s17_s13 }
   0x3   :  { %s348_s14 = scalar_lea.vmem %s18_s13, 256  ;;  %p353_p1 = scmp.lt.s32.totalorder %s18_s13, %s18_s13 }
   0x4   :  { %p349_p0 = scmp.ne.s32.totalorder %s18_s13, %s348_s14  ;;  %p354_p2 = scmp.lt.s32.totalorder %s348_s14, %s348_s14 }
   0x6   :  { %p355_p3 = por %p354_p2, %p353_p1 }
   0x8   :  { %p356_p4 = pnand %p355_p3, %p349_p0 }
   0xa   :  { %359 = shalt.err (!%p356_p4)
}
   0xb   :  { %s385_s15 = smov 128   ;;  %s386_s16 = smov 8  }
   0xc   :  { %23 = dma.hbm_to_vmem [thread:$0]  %s456_s1, 256, %s18_s13, [#allocation4], %s385_s15, %s385_s15, %s386_s16  }
   0xd   :  { %380 = dma.done.wait [#allocation4], 256  }
   0xe   :  { %381 = vsyncadd [#allocation4], 4294967040  ;;  %v33_v0 = vld [vmem:[%s455_s0] sm:$0xff]  ;;  %vm34_vm0 = vcmask 195584   ;;  %s387_s21 = smov 124   ;;  %s388_s22 = smov 126  }
   0xf   :  { %49 = vrot.lane.b32.xlu0 %v33_v0, %s387_s21  ;;  %35 = vst.msk [vmem:[#allocation2] sm:$0xff] %vm34_vm0, %v33_v0  ;;  %41 = vrot.lane.b32.xlu1 %v33_v0, %s388_s22  ;;  %s389_s23 = smov 125   ;;  %s390_s24 = smov 127   ;;  %v278_v1 = vld [vmem:[%s455_s0 + $0x8] sm:$0xff]  ;;  %vm68_vm1 = vcmask 326656   ;;  %v31_v5 = vld [vmem:[%s457_s2] sm:$0xff] }
  0x10   :  { %v29_v3 = vld [vmem:[#allocation3] sm:$0xff]  ;;  %v391_v6 = vmov 0   ;;  %v30_v20 = vld [vmem:[#allocation3 + $0x8] sm:$0xff]  ;;  %s392_s0 = smov [#allocation6]  }
  0x11   :  { %305 = vmatprep.mubr.msk.f32.mxu0 %vm68_vm1, %v29_v3  ;;  %318 = vmatprep.mubr.msk.f32.mxu1 %vm68_vm1, %v29_v3  ;;  %v32_v4 = vld [vmem:[%s457_s2 + $0x8] sm:$0xff]  ;;  %s264_s2 = sshll.u32 %s392_s0, 4  ;;  %s265_s2 = int_to_ptr.vmem [resolvable:$true] %s264_s2 }
  0x12   :  { %331 = vset.pattern.permute.xlu1 %v391_v6  ;;  %330 = vset.pattern.permute.xlu0 %v391_v6  ;;  %s360_s30 = scalar_lea.vmem %s265_s2, 512  ;;  %p365_p6 = scmp.lt.s32.totalorder %s265_s2, %s265_s2 }
  0x13   :  { %45 = vrot.lane.b32.xlu0 %v33_v0, %s389_s23  ;;  %37 = vrot.lane.b32.xlu1 %v33_v0, %s390_s24  ;;  %p361_p5 = scmp.ne.s32.totalorder %s265_s2, %s360_s30  ;;  %p366_p7 = scmp.lt.s32.totalorder %s360_s30, %s360_s30 }
  0x15   :  { %p367_p8 = por %p366_p7, %p365_p6 }
  0x16   :  { %v53_v2 = vld [vmem:[#allocation2] sm:$0xff] }
  0x17   :  { %170 = vrot.lane.b32.xlu0 %v278_v1, %s387_s21  ;;  %166 = vrot.lane.b32.xlu1 %v278_v1, %s389_s23  ;;  %156 = vst.msk [vmem:[#allocation2] sm:$0xff] %vm34_vm0, %v278_v1  ;;  %p368_p9 = pnand %p367_p8, %p361_p5 }
  0x1b   :  { %162 = vrot.lane.b32.xlu0 %v278_v1, %s388_s22  ;;  %158 = vrot.lane.b32.xlu1 %v278_v1, %s390_s24 }
  0x1e   :  { %v174_v24 = vld [vmem:[#allocation2] sm:$0xff] }
  0x1f   :  { %65 = vperm.xlu1 %331, %v32_v4   ;;  %60 = vperm.xlu0 %330, %v31_v5  }
  0x81   :  { %v50_v7 = vpop.permute.xlu0 %49  ;;  %v42_v8 = vpop.permute.xlu1 %41 }
  0x82   :  { %52 = vst.msk [vmem:[#allocation2 + $0x20] sm:$0xff] %vm34_vm0, %v50_v7  ;;  %44 = vst.msk [vmem:[#allocation2 + $0x10] sm:$0xff] %vm34_vm0, %v42_v8 }
  0x85   :  { %v46_v9 = vpop.permute.xlu0 %45  ;;  %v38_v10 = vpop.permute.xlu1 %37 }
  0x86   :  { %48 = vst.msk [vmem:[#allocation2 + $0x18] sm:$0xff] %vm34_vm0, %v46_v9  ;;  %40 = vst.msk [vmem:[#allocation2 + $0x8] sm:$0xff] %vm34_vm0, %v38_v10 }
  0x89   :  { %v57_v11 = vld [vmem:[#allocation2 + $0x20] sm:$0xff]  ;;  %v171_v12 = vpop.permute.xlu0 %170  ;;  %v167_v13 = vpop.permute.xlu1 %166  ;;  %v55_v16 = vld [vmem:[#allocation2 + $0x10] sm:$0xff] }
  0x8a   :  { %295 = vmatprep.subr.mxu0 %v57_v11  ;;  %173 = vst.msk [vmem:[#allocation2 + $0x20] sm:$0xff] %vm34_vm0, %v171_v12 }
  0x8b   :  { %296 = vmatpush3.msra.mxu0 %v57_v11 }
  0x8d   :  { %v56_v14 = vld [vmem:[#allocation2 + $0x18] sm:$0xff]  ;;  %v163_v15 = vpop.permute.xlu0 %162  ;;  %v159_v17 = vpop.permute.xlu1 %158  ;;  %v54_v18 = vld [vmem:[#allocation2 + $0x8] sm:$0xff] }
  0x8e   :  { %297 = vmatprep.subr.mxu0 %v56_v14  ;;  %169 = vst.msk [vmem:[#allocation2 + $0x18] sm:$0xff] %vm34_vm0, %v167_v13  ;;  %165 = vst.msk [vmem:[#allocation2 + $0x10] sm:$0xff] %vm34_vm0, %v163_v15 }
  0x8f   :  { %161 = vst.msk [vmem:[#allocation2 + $0x8] sm:$0xff] %vm34_vm0, %v159_v17  ;;  %298 = vmatpush3.msra.mxu0 %v56_v14 }
  0x90   :  { %299 = vmatprep.subr.mxu0 %v55_v16 }
  0x91   :  { %300 = vmatpush3.msra.mxu0 %v55_v16  ;;  %v178_v19 = vld [vmem:[#allocation2 + $0x20] sm:$0xff] }
  0x92   :  { %301 = vmatprep.subr.mxu0 %v54_v18  ;;  %308 = vmatprep.subr.mxu1 %v178_v19 }
  0x93   :  { %302 = vmatpush3.msra.mxu0 %v54_v18  ;;  %309 = vmatpush3.msra.mxu1 %v178_v19 }
  0x94   :  { %303 = vmatprep.subr.mxu0 %v53_v2 }
  0x95   :  { %v177_v21 = vld [vmem:[#allocation2 + $0x18] sm:$0xff]  ;;  %v176_v22 = vld [vmem:[#allocation2 + $0x10] sm:$0xff]  ;;  %304 = vmatpush3.msra.mxu0 %v53_v2 }
  0x96   :  { %310 = vmatprep.subr.mxu1 %v177_v21  ;;  %306 = vmatmul.mubr.msk.f32.vlgmr.msra.gmra.mxu0 %vm68_vm1, %v30_v20  ;;  %v175_v23 = vld [vmem:[#allocation2 + $0x8] sm:$0xff] }
  0x97   :  { %311 = vmatpush3.msra.mxu1 %v177_v21 }
  0x98   :  { %312 = vmatprep.subr.mxu1 %v176_v22 }
  0x99   :  { %313 = vmatpush3.msra.mxu1 %v176_v22 }
  0x9a   :  { %314 = vmatprep.subr.mxu1 %v175_v23  ;;  %v66_v25 = vpop.permute.xlu1 %65  ;;  %v61_v27 = vpop.permute.xlu0 %60 }
  0x9b   :  { %315 = vmatpush3.msra.mxu1 %v175_v23 }
  0x9c   :  { %316 = vmatprep.subr.mxu1 %v174_v24 }
  0x9d   :  { %317 = vmatpush3.msra.mxu1 %v174_v24 }
  0x9e   :  { %319 = vmatmul.mubr.msk.f32.vlgmr.msra.gmra.mxu1 %vm68_vm1, %v30_v20 }
 0x156   :  { %v307_v26 = vpop.f32.mrf.mxu0 }
 0x157   :  { %v147_v28 = vadd.f32 %v307_v26, %v66_v25 }
 0x158   :  { %v141_v29 = vpop.f32.mrf.mxu0 }
 0x159   :  { %332 = vtanh.f32 %v147_v28  ;;  %v142_v30 = vadd.f32 %v141_v29, %v61_v27 }
 0x15b   :  { %334 = vtanh.f32 %v142_v30 }
 0x15e   :  { %v320_v31 = vpop.f32.mrf.mxu1 }
 0x15f   :  { %v251_v32 = vadd.f32 %v320_v31, %v66_v25 }
 0x160   :  { %v245_v33 = vpop.f32.mrf.mxu1 }
 0x161   :  { %336 = vtanh.f32 %v251_v32  ;;  %v246_v34 = vadd.f32 %v245_v33, %v61_v27 }
 0x163   :  { %338 = vtanh.f32 %v246_v34 }
 0x166   :  { %v333_v35 = vpop.eup %332 }
 0x167   :  { %153 = vst.msk [vmem:[#allocation6 + $0x8] sm:$0xff] %vm34_vm0, %v333_v35 }
 0x168   :  { %v335_v36 = vpop.eup %334 }
 0x169   :  { %152 = vst.msk [vmem:[#allocation6] sm:$0xff] %vm34_vm0, %v335_v36 }
 0x16e   :  { %v337_v37 = vpop.eup %336 }
 0x16f   :  { %258 = vst.msk [vmem:[#allocation6 + $0x18] sm:$0xff] %vm34_vm0, %v337_v37 }
 0x170   :  { %v339_v38 = vpop.eup %338 }
 0x171   :  { %257 = vst.msk [vmem:[#allocation6 + $0x10] sm:$0xff] %vm34_vm0, %v339_v38 }
 0x172   :  { %371 = shalt.err (!%p368_p9)
}
 0x173   :  { %270 = dma.vmem_to_hbm [thread:$0]  %s265_s2, 512, %s458_s3, [#allocation5], %s385_s15, %s385_s15, %s386_s16  }
 0x174   :  { %382 = dma.done.wait [#allocation5], 512  }
 0x175   :  { %383 = vsyncadd [#allocation5], 4294966784 }
 0x176   :  { %274 = vsyncpa [#allocation4], 1 }
 0x177   :  { %275 = vsyncpa [#allocation5], 1 }

</bundles_post_ra>
